<compile_context>
chip_gen: v5e
topology: v5e:2x2
jax: 0.10.0
libtpu: 0.0.40
codegen_flags: <defaults>
</compile_context>

<pallas_src>
import jax
import jax.numpy as jnp
import numpy as np
from jax import lax
from jax.experimental import pallas as pl
from jax.experimental.pallas import tpu as pltpu

_NEG = -1e30        # "no pair here" sentinel (finite, beats any real cosine)
_EPS2 = 1e-16       # eps**2 for the rsqrt-based cosine (torch eps = 1e-8)


def _round_up(x, m):
    return ((x + m - 1) // m) * m


# -----------------------------------------------------------------------------
# Fused kernel: one grid step == one full tree (all merges for one sequence).
# -----------------------------------------------------------------------------
def _compose_words_kernel(lens_ref,                        # SMEM (B,) int32 (prefetch)
                          ws_ref, wl_ref, wr_ref, b_ref,   # VMEM inputs
                          out_ref,                         # VMEM output (1,1,E_pad)
                          ws_buf, cos_buf,                 # VMEM scratch
                          next_s, prev_s, head_s):         # SMEM scratch
    n_pad = ws_buf.shape[0]
    b = pl.program_id(0)
    n = lens_ref[b]                                        # active length (<= n_pad)

    # ---- per-sequence state init --------------------------------------------
    ws_buf[...] = ws_ref[0]                                # resident working copy
    cos_buf[...] = jnp.full(cos_buf.shape, _NEG, jnp.float32)
    head_s[0] = jnp.int32(0)

    wl = wl_ref[...]                                       # (1, E_pad), loaded once
    wr = wr_ref[...]
    bb = b_ref[...]

    # doubly linked list of alive rows (original slots); n_pad means "no next"
    @pl.loop(0, n_pad)
    def _(i):
        next_s[i] = jnp.where(i + 1 >= n, jnp.int32(n_pad), i + 1)
        prev_s[i] = i - 1                                  # -1 means "no prev"

    def _cos(u, v):                                        # u, v: (1, E_pad)
        d = jnp.sum(u * v, axis=1, keepdims=True)
        u2 = jnp.sum(u * u, axis=1, keepdims=True)
        v2 = jnp.sum(v * v, axis=1, keepdims=True)
        # rsqrt goes to the EUP slot (free next to the VPU work)
        return d * lax.rsqrt(u2 + _EPS2) * lax.rsqrt(v2 + _EPS2)

    # initial consecutive-pair cosines (runs once; O(L*E))
    @pl.loop(0, n - 1)
    def _(i):
        a = ws_buf[pl.ds(i, 1), :]
        c = ws_buf[pl.ds(i + 1, 1), :]
        cos_buf[pl.ds(i, 1), :] = _cos(a, c)

    # ---- greedy merge loop: n-1 steps, all state stays resident ---------------
    @pl.loop(0, n - 1)
    def _(step):
        cosv = cos_buf[...]                                # (N_pad, 1)
        m = jnp.max(cosv)
        rid = lax.broadcasted_iota(jnp.int32, cosv.shape, 0)
        # first-occurrence argmax (matches torch.argmax tie-breaking)
        p = jnp.min(jnp.where(cosv >= m, rid, jnp.int32(n_pad)))
        q = next_s[p]                                      # right child slot

        left = ws_buf[pl.ds(p, 1), :]
        right = ws_buf[pl.ds(q, 1), :]
        # TODO(synk): stand-in per-channel affine Compose (real Compose module
        # definition not provided in the reference source).
        parent = wl * left + wr * right + bb
        ws_buf[pl.ds(q, 1), :] = parent                    # ws[mi+1] = parent

        pp = prev_s[p]                                     # neighbour bookkeeping
        nq = next_s[q]
        prev_s[q] = pp                                     # "delete" row p
        cos_buf[pl.ds(p, 1), :] = jnp.full((1, 1), _NEG, jnp.float32)

        @pl.when(pp >= 0)                                  # pair (prev, parent)
        def _():
            next_s[pp] = q
            lrow = ws_buf[pl.ds(pp, 1), :]
            cos_buf[pl.ds(pp, 1), :] = _cos(lrow, parent)

        @pl.when(pp < 0)                                   # merged away the head
        def _():
            head_s[0] = q

        @pl.when(nq < jnp.int32(n_pad))                    # pair (parent, next)
        def _():
            rrow = ws_buf[pl.ds(nq, 1), :]
            cos_buf[pl.ds(q, 1), :] = _cos(parent, rrow)

    # ---- emit the root ---------------------------------------------------------
    out_ref[0] = ws_buf[pl.ds(head_s[0], 1), :]


# -----------------------------------------------------------------------------
# Wrapper: pad to lane/sublane-friendly shapes and launch one batched call.
# -----------------------------------------------------------------------------
@jax.jit
def _compose_words_pallas(emb, wl, wr, b, seqs, lengths):
    B, L = seqs.shape
    E = emb.shape[1]
    e_pad = max(128, _round_up(E, 128))     # lane-dense last dim
    n_pad = max(8, _round_up(L, 8))         # sublane-aligned row count

    ws = emb[seqs].astype(jnp.float32)                               # (B, L, E)
    ws_p = jnp.zeros((B, n_pad, e_pad), jnp.float32).at[:, :L, :E].set(ws)
    wl_p = jnp.zeros((1, e_pad), jnp.float32).at[:, :E].set(wl)
    wr_p = jnp.zeros((1, e_pad), jnp.float32).at[:, :E].set(wr)
    b_p = jnp.zeros((1, e_pad), jnp.float32).at[:, :E].set(b)

    grid_spec = pltpu.PrefetchScalarGridSpec(
        num_scalar_prefetch=1,                 # per-sequence lengths -> SMEM
        grid=(B,),
        in_specs=[
            pl.BlockSpec((1, n_pad, e_pad), lambda i, lens: (i, 0, 0)),
            pl.BlockSpec((1, e_pad), lambda i, lens: (0, 0)),
            pl.BlockSpec((1, e_pad), lambda i, lens: (0, 0)),
            pl.BlockSpec((1, e_pad), lambda i, lens: (0, 0)),
        ],
        out_specs=pl.BlockSpec((1, 1, e_pad), lambda i, lens: (i, 0, 0)),
        scratch_shapes=[
            pltpu.VMEM((n_pad, e_pad), jnp.float32),   # resident word sequence
            pltpu.VMEM((n_pad, 1), jnp.float32),       # consecutive-pair cosines
            pltpu.SMEM((n_pad,), jnp.int32),           # next alive row
            pltpu.SMEM((n_pad,), jnp.int32),           # prev alive row
            pltpu.SMEM((1,), jnp.int32),               # head (root slot)
        ],
    )
    out = pl.pallas_call(
        _compose_words_kernel,
        grid_spec=grid_spec,
        out_shape=jax.ShapeDtypeStruct((B, 1, e_pad), jnp.float32),
        compiler_params=pltpu.CompilerParams(
            dimension_semantics=("parallel",),   # independent trees -> both TCs (v7x)
        ),
    )(lengths.astype(jnp.int32), ws_p, wl_p, wr_p, b_p)
    return out[:, 0, :E]


def banyan_compose_words_batch(params, seqs, lengths):
    """Banyan.forward(seqs, words=True) for a batch of independent sequences."""
    return _compose_words_pallas(params["embedding"], params["wl"],
                                 params["wr"], params["b"], seqs, lengths)


def banyan_compose_words(params, seq):
    """Single-sequence API matching the reference module."""
    out = banyan_compose_words_batch(
        params, seq[None, :], jnp.array([seq.shape[0]], jnp.int32))
    return out[0]


# -----------------------------------------------------------------------------
# Parameter construction (deterministic, synthetic — no checkpoint loading)
# -----------------------------------------------------------------------------
def init_params(key, vocab_size, embedding_size, channels, r=0.1):
    e = embedding_size // channels
    k_emb, k_wl, k_wr, k_b = jax.random.split(key, 4)
    emb = jax.random.uniform(
        k_emb, (vocab_size, embedding_size), jnp.float32, minval=-r, maxval=r)
    # padding row == -inf, matching the reference __init__
    emb = emb.at[vocab_size - 1].set(-jnp.inf)

    # per-channel compose parameters, expanded to (1, E) layout
    wl_ch = jax.random.uniform(k_wl, (channels,), jnp.float32, 0.4, 0.6)
    wr_ch = jax.random.uniform(k_wr, (channels,), jnp.float32, 0.4, 0.6)
    b_ch = jax.random.uniform(k_b, (channels,), jnp.float32, -0.05, 0.05)
    wl = jnp.repeat(wl_ch, e)[None, :]
    wr = jnp.repeat(wr_ch, e)[None, :]
    b = jnp.repeat(b_ch, e)[None, :]
    return {"embedding": emb, "wl": wl, "wr": wr, "b": b}


# -----------------------------------------------------------------------------
# Pure-NumPy reference (mirrors the torch compose_words loop, same stand-in
# Compose) for a parity check.
# -----------------------------------------------------------------------------
def _reference_compose_words(params, seq):
    emb = np.asarray(params["embedding"], np.float32)
    wl = np.asarray(params["wl"], np.float32)[0]
    wr = np.asarray(params["wr"], np.float32)[0]
    bb = np.asarray(params["b"], np.float32)[0]
    ws = emb[np.asarray(seq)]
    while ws.shape[0] != 1:
        a, c = ws[:-1], ws[1:]
        dot = (a * c).sum(-1)
        na = np.maximum(np.sqrt((a * a).sum(-1)), 1e-8)
        nc = np.maximum(np.sqrt((c * c).sum(-1)), 1e-8)
        mi = int(np.argmax(dot / (na * nc)))
        parent = wl * ws[mi] + wr * ws[mi + 1] + bb
        ws[mi + 1] = parent
        ws = np.delete(ws, mi, axis=0)
    return ws[0]


if __name__ == "__main__":
    vocab_size = 32
    embedding_size = 32   # E (channels=4 -> e=8); lane-padded to 128 in-kernel
    channels = 4
    batch = 2
    seq_len = 8

    key = jax.random.PRNGKey(0)
    k_params, k_seq = jax.random.split(key)
    params = init_params(k_params, vocab_size, embedding_size, channels, r=0.1)

    # avoid the padding index (vocab_size - 1, whose embedding row is -inf)
    seqs = jax.random.randint(k_seq, (batch, seq_len), 0, vocab_size - 1, jnp.int32)
    lengths = jnp.full((batch,), seq_len, jnp.int32)

    out = banyan_compose_words_batch(params, seqs, lengths)    # (batch, E)
    out = jax.block_until_ready(out)

    assert out.shape == (batch, embedding_size)
    assert bool(jnp.all(jnp.isfinite(out)))

    ref = np.stack([_reference_compose_words(params, s) for s in np.asarray(seqs)])
    np.testing.assert_allclose(np.asarray(out), ref, rtol=2e-3, atol=2e-3)

    print("KERNEL_OK")
</pallas_src>

<mosaic_0001>
module attributes {stable_mosaic.version = 11 : i64} {
  func.func @_compose_words_kernel(%arg0: i32, %arg1: memref<2xi32, #tpu.memory_space<smem>>, %arg2: memref<1x8x128xf32, #tpu.memory_space<vmem>>, %arg3: memref<1x128xf32, #tpu.memory_space<vmem>>, %arg4: memref<1x128xf32, #tpu.memory_space<vmem>>, %arg5: memref<1x128xf32, #tpu.memory_space<vmem>>, %arg6: memref<1x1x128xf32, #tpu.memory_space<vmem>>, %arg7: memref<8x128xf32, #tpu.memory_space<vmem>>, %arg8: memref<8x1xf32, #tpu.memory_space<vmem>>, %arg9: memref<8xi32, #tpu.memory_space<smem>>, %arg10: memref<8xi32, #tpu.memory_space<smem>>, %arg11: memref<1xi32, #tpu.memory_space<smem>>) attributes {dimension_semantics = [#tpu.dimension_semantics<parallel>], iteration_bounds = array<i64: 2>, scalar_prefetch = 1 : i64, scratch_operands = 5 : i64, tpu.core_type = #tpu.core_type<tc>, window_params = [{transform_indices = @transform_0, window_bounds = array<i64: 1, 8, 128>}, {pipeline_mode = #tpu.pipeline_mode<synchronous>, transform_indices = @transform_1, window_bounds = array<i64: 1, 128>}, {pipeline_mode = #tpu.pipeline_mode<synchronous>, transform_indices = @transform_2, window_bounds = array<i64: 1, 128>}, {pipeline_mode = #tpu.pipeline_mode<synchronous>, transform_indices = @transform_3, window_bounds = array<i64: 1, 128>}, {transform_indices = @transform_4, window_bounds = array<i64: 1, 1, 128>}]} {
    %0 = arith.index_cast %arg0 : i32 to index
    %1 = memref.load %arg1[%0] : memref<2xi32, #tpu.memory_space<smem>>
    %c0 = arith.constant 0 : index
    %c0_0 = arith.constant 0 : index
    %c0_1 = arith.constant 0 : index
    %2 = vector.load %arg2[%c0, %c0_0, %c0_1] : memref<1x8x128xf32, #tpu.memory_space<vmem>>, vector<1x8x128xf32>
    %3 = vector.shape_cast %2 : vector<1x8x128xf32> to vector<8x128xf32>
    %c0_2 = arith.constant 0 : index
    %c0_3 = arith.constant 0 : index
    %4 = vector.load %arg7[%c0_2, %c0_3] : memref<8x128xf32, #tpu.memory_space<vmem>>, vector<8x128xf32>
    tpu.vector_store %arg7[%c0_2, %c0_3], %3 {strides = array<i32>} : memref<8x128xf32, #tpu.memory_space<vmem>>, vector<8x128xf32>,
    %cst = arith.constant -1.000000e+30 : f32
    %5 = vector.broadcast %cst : f32 to vector<8x1xf32>
    %c0_4 = arith.constant 0 : index
    %c0_5 = arith.constant 0 : index
    %6 = vector.load %arg8[%c0_4, %c0_5] : memref<8x1xf32, #tpu.memory_space<vmem>>, vector<8x1xf32>
    tpu.vector_store %arg8[%c0_4, %c0_5], %5 {strides = array<i32>} : memref<8x1xf32, #tpu.memory_space<vmem>>, vector<8x1xf32>,
    %c0_i32 = arith.constant 0 : i32
    %c0_6 = arith.constant 0 : index
    %7 = memref.load %arg11[%c0_6] : memref<1xi32, #tpu.memory_space<smem>>
    memref.store %c0_i32, %arg11[%c0_6] : memref<1xi32, #tpu.memory_space<smem>>
    %c0_7 = arith.constant 0 : index
    %c0_8 = arith.constant 0 : index
    %8 = vector.load %arg3[%c0_7, %c0_8] : memref<1x128xf32, #tpu.memory_space<vmem>>, vector<1x128xf32>
    %c0_9 = arith.constant 0 : index
    %c0_10 = arith.constant 0 : index
    %9 = vector.load %arg4[%c0_9, %c0_10] : memref<1x128xf32, #tpu.memory_space<vmem>>, vector<1x128xf32>
    %c0_11 = arith.constant 0 : index
    %c0_12 = arith.constant 0 : index
    %10 = vector.load %arg5[%c0_11, %c0_12] : memref<1x128xf32, #tpu.memory_space<vmem>>, vector<1x128xf32>
    %c0_i32_13 = arith.constant 0 : i32
    %c8_i32 = arith.constant 8 : i32
    %11 = arith.addi %c0_i32_13, %c8_i32 : i32
    %c1_i32 = arith.constant 1 : i32
    scf.for %arg12 = %c0_i32_13 to %11 step %c1_i32  : i32 {
      %c1_i32_38 = arith.constant 1 : i32
      %32 = arith.muli %arg12, %c1_i32_38 : i32
      %c0_i32_39 = arith.constant 0 : i32
      %33 = arith.addi %c0_i32_39, %32 : i32
      %c1_i32_40 = arith.constant 1 : i32
      %34 = arith.addi %33, %c1_i32_40 : i32
      %35 = arith.cmpi sge, %34, %1 : i32
      %c1_i32_41 = arith.constant 1 : i32
      %36 = arith.addi %33, %c1_i32_41 : i32
      %c8_i32_42 = arith.constant 8 : i32
      %37 = arith.select %35, %c8_i32_42, %36 : i32
      %38 = arith.index_cast %33 : i32 to index
      %39 = memref.load %arg9[%38] : memref<8xi32, #tpu.memory_space<smem>>
      memref.store %37, %arg9[%38] : memref<8xi32, #tpu.memory_space<smem>>
      %c1_i32_43 = arith.constant 1 : i32
      %40 = arith.subi %33, %c1_i32_43 : i32
      %41 = arith.index_cast %33 : i32 to index
      %42 = memref.load %arg10[%41] : memref<8xi32, #tpu.memory_space<smem>>
      memref.store %40, %arg10[%41] : memref<8xi32, #tpu.memory_space<smem>>
    }
    %c8_i32_14 = arith.constant 8 : i32
    %c1_i32_15 = arith.constant 1 : i32
    %12 = arith.subi %1, %c1_i32_15 : i32
    %c0_i32_16 = arith.constant 0 : i32
    %13 = arith.subi %12, %c0_i32_16 : i32
    %c1_i32_17 = arith.constant 1 : i32
    %c1_i32_18 = arith.constant 1 : i32
    %14 = arith.subi %c1_i32_17, %c1_i32_18 : i32
    %15 = arith.addi %13, %14 : i32
    %c1_i32_19 = arith.constant 1 : i32
    %16 = arith.divsi %15, %c1_i32_19 : i32
    %c1_i32_20 = arith.constant 1 : i32
    %c0_i32_21 = arith.constant 0 : i32
    %c0_i32_22 = arith.constant 0 : i32
    %17 = arith.subi %16, %c0_i32_22 : i32
    %18 = arith.addi %c0_i32_22, %17 : i32
    %c1_i32_23 = arith.constant 1 : i32
    scf.for %arg12 = %c0_i32_22 to %18 step %c1_i32_23  : i32 {
      %32 = arith.muli %arg12, %c1_i32_20 : i32
      %33 = arith.addi %c0_i32_21, %32 : i32
      %34 = arith.index_cast %33 : i32 to index
      %c0_38 = arith.constant 0 : index
      %35 = vector.load %arg7[%34, %c0_38] : memref<8x128xf32, #tpu.memory_space<vmem>>, vector<1x128xf32>
      %c1_i32_39 = arith.constant 1 : i32
      %36 = arith.addi %33, %c1_i32_39 : i32
      %37 = arith.index_cast %36 : i32 to index
      %c0_40 = arith.constant 0 : index
      %38 = vector.load %arg7[%37, %c0_40] : memref<8x128xf32, #tpu.memory_space<vmem>>, vector<1x128xf32>
      %39 = arith.mulf %35, %38 : vector<1x128xf32>
      %cst_41 = arith.constant dense<0.000000e+00> : vector<1xf32>
      %40 = vector.multi_reduction <add>, %39, %cst_41 [1] : vector<1x128xf32> to vector<1xf32>
      %41 = vector.shape_cast %40 : vector<1xf32> to vector<1x1xf32>
      %42 = arith.mulf %35, %35 : vector<1x128xf32>
      %cst_42 = arith.constant dense<0.000000e+00> : vector<1xf32>
      %43 = vector.multi_reduction <add>, %42, %cst_42 [1] : vector<1x128xf32> to vector<1xf32>
      %44 = vector.shape_cast %43 : vector<1xf32> to vector<1x1xf32>
      %45 = arith.mulf %38, %38 : vector<1x128xf32>
      %cst_43 = arith.constant dense<0.000000e+00> : vector<1xf32>
      %46 = vector.multi_reduction <add>, %45, %cst_43 [1] : vector<1x128xf32> to vector<1xf32>
      %47 = vector.shape_cast %46 : vector<1xf32> to vector<1x1xf32>
      %cst_44 = arith.constant 1.000000e-16 : f32
      %48 = vector.broadcast %cst_44 : f32 to vector<1x1xf32>
      %49 = arith.addf %44, %48 : vector<1x1xf32>
      %50 = math.rsqrt %49 : vector<1x1xf32>
      %51 = arith.mulf %41, %50 : vector<1x1xf32>
      %cst_45 = arith.constant 1.000000e-16 : f32
      %52 = vector.broadcast %cst_45 : f32 to vector<1x1xf32>
      %53 = arith.addf %47, %52 : vector<1x1xf32>
      %54 = math.rsqrt %53 : vector<1x1xf32>
      %55 = arith.mulf %51, %54 : vector<1x1xf32>
      %56 = arith.index_cast %33 : i32 to index
      %c0_46 = arith.constant 0 : index
      %57 = vector.load %arg8[%56, %c0_46] : memref<8x1xf32, #tpu.memory_space<vmem>>, vector<1x1xf32>
      tpu.vector_store %arg8[%56, %c0_46], %55 {strides = array<i32>} : memref<8x1xf32, #tpu.memory_space<vmem>>, vector<1x1xf32>,
    }
    %c1_i32_24 = arith.constant 1 : i32
    %19 = arith.subi %1, %c1_i32_24 : i32
    %c0_i32_25 = arith.constant 0 : i32
    %20 = arith.subi %19, %c0_i32_25 : i32
    %c1_i32_26 = arith.constant 1 : i32
    %c1_i32_27 = arith.constant 1 : i32
    %21 = arith.subi %c1_i32_26, %c1_i32_27 : i32
    %22 = arith.addi %20, %21 : i32
    %c1_i32_28 = arith.constant 1 : i32
    %23 = arith.divsi %22, %c1_i32_28 : i32
    %c1_i32_29 = arith.constant 1 : i32
    %c0_i32_30 = arith.constant 0 : i32
    %c0_i32_31 = arith.constant 0 : i32
    %24 = arith.subi %23, %c0_i32_31 : i32
    %25 = arith.addi %c0_i32_31, %24 : i32
    %c1_i32_32 = arith.constant 1 : i32
    scf.for %arg12 = %c0_i32_31 to %25 step %c1_i32_32  : i32 {
      %32 = arith.muli %arg12, %c1_i32_29 : i32
      %33 = arith.addi %c0_i32_30, %32 : i32
      %c0_38 = arith.constant 0 : index
      %c0_39 = arith.constant 0 : index
      %34 = vector.load %arg8[%c0_38, %c0_39] : memref<8x1xf32, #tpu.memory_space<vmem>>, vector<8x1xf32>
      %35 = vector.shape_cast %34 : vector<8x1xf32> to vector<1x8x1xf32>
      %cst_40 = arith.constant dense<0xFF800000> : vector<1xf32>
      %36 = vector.multi_reduction <maximumf>, %35, %cst_40 [1, 2] : vector<1x8x1xf32> to vector<1xf32>
      %37 = vector.shape_cast %36 : vector<1xf32> to vector<1x1x1xf32>
      %38 = vector.extract %37[0, 0, 0] : f32 from vector<1x1x1xf32>
      %39 = tpu.iota {dimensions = array<i32: 0>} : vector<8x1xi32>
      %40 = vector.broadcast %38 : f32 to vector<8x1xf32>
      %41 = arith.cmpf oge, %34, %40 : vector<8x1xf32>
      %c8_i32_41 = arith.constant 8 : i32
      %42 = vector.broadcast %c8_i32_41 : i32 to vector<8x1xi32>
      %43 = arith.select %41, %39, %42 : vector<8x1xi1>, vector<8x1xi32>
      %44 = vector.shape_cast %43 : vector<8x1xi32> to vector<1x8x1xi32>
      %cst_42 = arith.constant dense<2147483647> : vector<1xi32>
      %45 = vector.multi_reduction <minsi>, %44, %cst_42 [1, 2] : vector<1x8x1xi32> to vector<1xi32>
      %46 = vector.shape_cast %45 : vector<1xi32> to vector<1x1x1xi32>
      %47 = vector.extract %46[0, 0, 0] : i32 from vector<1x1x1xi32>
      %48 = arith.index_cast %47 : i32 to index
      %49 = memref.load %arg9[%48] : memref<8xi32, #tpu.memory_space<smem>>
      %50 = arith.index_cast %47 : i32 to index
      %c0_43 = arith.constant 0 : index
      %51 = vector.load %arg7[%50, %c0_43] : memref<8x128xf32, #tpu.memory_space<vmem>>, vector<1x128xf32>
      %52 = arith.index_cast %49 : i32 to index
      %c0_44 = arith.constant 0 : index
      %53 = vector.load %arg7[%52, %c0_44] : memref<8x128xf32, #tpu.memory_space<vmem>>, vector<1x128xf32>
      %54 = arith.mulf %8, %51 : vector<1x128xf32>
      %55 = arith.mulf %9, %53 : vector<1x128xf32>
      %56 = arith.addf %54, %55 : vector<1x128xf32>
      %57 = arith.addf %56, %10 : vector<1x128xf32>
      %58 = arith.index_cast %49 : i32 to index
      %c0_45 = arith.constant 0 : index
      %59 = vector.load %arg7[%58, %c0_45] : memref<8x128xf32, #tpu.memory_space<vmem>>, vector<1x128xf32>
      tpu.vector_store %arg7[%58, %c0_45], %57 {strides = array<i32>} : memref<8x128xf32, #tpu.memory_space<vmem>>, vector<1x128xf32>,
      %60 = arith.index_cast %47 : i32 to index
      %61 = memref.load %arg10[%60] : memref<8xi32, #tpu.memory_space<smem>>
      %62 = arith.index_cast %49 : i32 to index
      %63 = memref.load %arg9[%62] : memref<8xi32, #tpu.memory_space<smem>>
      %64 = arith.index_cast %49 : i32 to index
      %65 = memref.load %arg10[%64] : memref<8xi32, #tpu.memory_space<smem>>
      memref.store %61, %arg10[%64] : memref<8xi32, #tpu.memory_space<smem>>
      %cst_46 = arith.constant -1.000000e+30 : f32
      %66 = vector.broadcast %cst_46 : f32 to vector<1x1xf32>
      %67 = arith.index_cast %47 : i32 to index
      %c0_47 = arith.constant 0 : index
      %68 = vector.load %arg8[%67, %c0_47] : memref<8x1xf32, #tpu.memory_space<vmem>>, vector<1x1xf32>
      tpu.vector_store %arg8[%67, %c0_47], %66 {strides = array<i32>} : memref<8x1xf32, #tpu.memory_space<vmem>>, vector<1x1xf32>,
      %c0_i32_48 = arith.constant 0 : i32
      %69 = arith.cmpi sge, %61, %c0_i32_48 : i32
      %70 = arith.extui %69 : i1 to i32
      %c0_i32_49 = arith.constant 0 : i32
      %71 = arith.cmpi ne, %70, %c0_i32_49 : i32
      scf.if %71 {
        %78 = arith.index_cast %61 : i32 to index
        %79 = memref.load %arg9[%78] : memref<8xi32, #tpu.memory_space<smem>>
        memref.store %49, %arg9[%78] : memref<8xi32, #tpu.memory_space<smem>>
        %80 = arith.index_cast %61 : i32 to index
        %c0_54 = arith.constant 0 : index
        %81 = vector.load %arg7[%80, %c0_54] : memref<8x128xf32, #tpu.memory_space<vmem>>, vector<1x128xf32>
        %82 = arith.mulf %81, %57 : vector<1x128xf32>
        %cst_55 = arith.constant dense<0.000000e+00> : vector<1xf32>
        %83 = vector.multi_reduction <add>, %82, %cst_55 [1] : vector<1x128xf32> to vector<1xf32>
        %84 = vector.shape_cast %83 : vector<1xf32> to vector<1x1xf32>
        %85 = arith.mulf %81, %81 : vector<1x128xf32>
        %cst_56 = arith.constant dense<0.000000e+00> : vector<1xf32>
        %86 = vector.multi_reduction <add>, %85, %cst_56 [1] : vector<1x128xf32> to vector<1xf32>
        %87 = vector.shape_cast %86 : vector<1xf32> to vector<1x1xf32>
        %88 = arith.mulf %57, %57 : vector<1x128xf32>
        %cst_57 = arith.constant dense<0.000000e+00> : vector<1xf32>
        %89 = vector.multi_reduction <add>, %88, %cst_57 [1] : vector<1x128xf32> to vector<1xf32>
        %90 = vector.shape_cast %89 : vector<1xf32> to vector<1x1xf32>
        %cst_58 = arith.constant 1.000000e-16 : f32
        %91 = vector.broadcast %cst_58 : f32 to vector<1x1xf32>
        %92 = arith.addf %87, %91 : vector<1x1xf32>
        %93 = math.rsqrt %92 : vector<1x1xf32>
        %94 = arith.mulf %84, %93 : vector<1x1xf32>
        %cst_59 = arith.constant 1.000000e-16 : f32
        %95 = vector.broadcast %cst_59 : f32 to vector<1x1xf32>
        %96 = arith.addf %90, %95 : vector<1x1xf32>
        %97 = math.rsqrt %96 : vector<1x1xf32>
        %98 = arith.mulf %94, %97 : vector<1x1xf32>
        %99 = arith.index_cast %61 : i32 to index
        %c0_60 = arith.constant 0 : index
        %100 = vector.load %arg8[%99, %c0_60] : memref<8x1xf32, #tpu.memory_space<vmem>>, vector<1x1xf32>
        tpu.vector_store %arg8[%99, %c0_60], %98 {strides = array<i32>} : memref<8x1xf32, #tpu.memory_space<vmem>>, vector<1x1xf32>,
      } else {
      }
      %c0_i32_50 = arith.constant 0 : i32
      %72 = arith.cmpi slt, %61, %c0_i32_50 : i32
      %73 = arith.extui %72 : i1 to i32
      %c0_i32_51 = arith.constant 0 : i32
      %74 = arith.cmpi ne, %73, %c0_i32_51 : i32
      scf.if %74 {
        %c0_54 = arith.constant 0 : index
        %78 = memref.load %arg11[%c0_54] : memref<1xi32, #tpu.memory_space<smem>>
        memref.store %49, %arg11[%c0_54] : memref<1xi32, #tpu.memory_space<smem>>
      } else {
      }
      %c8_i32_52 = arith.constant 8 : i32
      %75 = arith.cmpi slt, %63, %c8_i32_52 : i32
      %76 = arith.extui %75 : i1 to i32
      %c0_i32_53 = arith.constant 0 : i32
      %77 = arith.cmpi ne, %76, %c0_i32_53 : i32
      scf.if %77 {
        %78 = arith.index_cast %63 : i32 to index
        %c0_54 = arith.constant 0 : index
        %79 = vector.load %arg7[%78, %c0_54] : memref<8x128xf32, #tpu.memory_space<vmem>>, vector<1x128xf32>
        %80 = arith.mulf %57, %79 : vector<1x128xf32>
        %cst_55 = arith.constant dense<0.000000e+00> : vector<1xf32>
        %81 = vector.multi_reduction <add>, %80, %cst_55 [1] : vector<1x128xf32> to vector<1xf32>
        %82 = vector.shape_cast %81 : vector<1xf32> to vector<1x1xf32>
        %83 = arith.mulf %57, %57 : vector<1x128xf32>
        %cst_56 = arith.constant dense<0.000000e+00> : vector<1xf32>
        %84 = vector.multi_reduction <add>, %83, %cst_56 [1] : vector<1x128xf32> to vector<1xf32>
        %85 = vector.shape_cast %84 : vector<1xf32> to vector<1x1xf32>
        %86 = arith.mulf %79, %79 : vector<1x128xf32>
        %cst_57 = arith.constant dense<0.000000e+00> : vector<1xf32>
        %87 = vector.multi_reduction <add>, %86, %cst_57 [1] : vector<1x128xf32> to vector<1xf32>
        %88 = vector.shape_cast %87 : vector<1xf32> to vector<1x1xf32>
        %cst_58 = arith.constant 1.000000e-16 : f32
        %89 = vector.broadcast %cst_58 : f32 to vector<1x1xf32>
        %90 = arith.addf %85, %89 : vector<1x1xf32>
        %91 = math.rsqrt %90 : vector<1x1xf32>
        %92 = arith.mulf %82, %91 : vector<1x1xf32>
        %cst_59 = arith.constant 1.000000e-16 : f32
        %93 = vector.broadcast %cst_59 : f32 to vector<1x1xf32>
        %94 = arith.addf %88, %93 : vector<1x1xf32>
        %95 = math.rsqrt %94 : vector<1x1xf32>
        %96 = arith.mulf %92, %95 : vector<1x1xf32>
        %97 = arith.index_cast %49 : i32 to index
        %c0_60 = arith.constant 0 : index
        %98 = vector.load %arg8[%97, %c0_60] : memref<8x1xf32, #tpu.memory_space<vmem>>, vector<1x1xf32>
        tpu.vector_store %arg8[%97, %c0_60], %96 {strides = array<i32>} : memref<8x1xf32, #tpu.memory_space<vmem>>, vector<1x1xf32>,
      } else {
      }
    }
    %c0_33 = arith.constant 0 : index
    %26 = memref.load %arg11[%c0_33] : memref<1xi32, #tpu.memory_space<smem>>
    %27 = arith.index_cast %26 : i32 to index
    %c0_34 = arith.constant 0 : index
    %28 = vector.load %arg7[%27, %c0_34] : memref<8x128xf32, #tpu.memory_space<vmem>>, vector<1x128xf32>
    %c0_35 = arith.constant 0 : index
    %c0_36 = arith.constant 0 : index
    %c0_37 = arith.constant 0 : index
    %29 = vector.load %arg6[%c0_35, %c0_36, %c0_37] : memref<1x1x128xf32, #tpu.memory_space<vmem>>, vector<1x1x128xf32>
    %30 = vector.shape_cast %29 : vector<1x1x128xf32> to vector<1x128xf32>
    %31 = vector.shape_cast %28 : vector<1x128xf32> to vector<1x1x128xf32>
    tpu.vector_store %arg6[%c0_35, %c0_36, %c0_37], %31 {strides = array<i32>} : memref<1x1x128xf32, #tpu.memory_space<vmem>>, vector<1x1x128xf32>,
    return
  }
  func.func @transform_0(%arg0: i32, %arg1: memref<2xi32, #tpu.memory_space<smem>>) -> (i32, i32, i32) {
    %c0_i32 = arith.constant 0 : i32
    %c0_i32_0 = arith.constant 0 : i32
    %c0_i32_1 = arith.constant 0 : i32
    return %arg0, %c0_i32, %c0_i32_0 : i32, i32, i32
  }
  func.func @transform_1(%arg0: i32, %arg1: memref<2xi32, #tpu.memory_space<smem>>) -> (i32, i32) {
    %c0_i32 = arith.constant 0 : i32
    %c0_i32_0 = arith.constant 0 : i32
    %c0_i32_1 = arith.constant 0 : i32
    return %c0_i32, %c0_i32_0 : i32, i32
  }
  func.func @transform_2(%arg0: i32, %arg1: memref<2xi32, #tpu.memory_space<smem>>) -> (i32, i32) {
    %c0_i32 = arith.constant 0 : i32
    %c0_i32_0 = arith.constant 0 : i32
    %c0_i32_1 = arith.constant 0 : i32
    return %c0_i32, %c0_i32_0 : i32, i32
  }
  func.func @transform_3(%arg0: i32, %arg1: memref<2xi32, #tpu.memory_space<smem>>) -> (i32, i32) {
    %c0_i32 = arith.constant 0 : i32
    %c0_i32_0 = arith.constant 0 : i32
    %c0_i32_1 = arith.constant 0 : i32
    return %c0_i32, %c0_i32_0 : i32, i32
  }
  func.func @transform_4(%arg0: i32, %arg1: memref<2xi32, #tpu.memory_space<smem>>) -> (i32, i32, i32) {
    %c0_i32 = arith.constant 0 : i32
    %c0_i32_0 = arith.constant 0 : i32
    %c0_i32_1 = arith.constant 0 : i32
    return %arg0, %c0_i32, %c0_i32_0 : i32, i32, i32
  }
}

</mosaic_0001>

<bundles_post_ra>
// kernel: _compose_words_pallas.1
= control target key start
LH: loop header
LB: loop body
LE: loop exit
PB: predicated region body
PF: predicated region fallthrough
CT: control target
= control target key end

     0   :  { %s744_s21 = smov [#allocation8]   ;;  %s949_s0 = inlined_call_operand.vmem [shape: s32[2], index: 0, kind: input, shape index: {}]   ;;  %s950_s1 = inlined_call_operand.vmem [shape: f32[2,8,128], index: 1, kind: input, shape index: {}]   ;;  %s951_s2 = inlined_call_operand.vmem [shape: f32[1,128], index: 2, kind: input, shape index: {}]   ;;  %s952_s3 = inlined_call_operand.vmem [shape: f32[1,128], index: 3, kind: input, shape index: {}]   ;;  %s953_s4 = inlined_call_operand.vmem [shape: f32[1,128], index: 4, kind: input, shape index: {}]   ;;  %s954_s5 = inlined_call_operand.hbm [shape: f32[2,1,128], index: 5, kind: output, shape index: {}]  }
   0x1   :  { %s11_s20 = sshll.u32 %s949_s0, 4  ;;  %s12_s20 = int_to_ptr.vmem [resolvable:$true] %s11_s20 }
   0x2   :  { %14 = dma.vmem_to_smem %s12_s20, 16, %s744_s21, [#allocation7] }
   0x3   :  { %710 = dma.done.wait [#allocation7], 16 }
   0x4   :  { %711 = vsyncadd [#allocation7], 4294967280 }
   0x5   :  { %17 = sfence }
   0x6   :  { %18 = vsyncpa [#allocation10], 0 }
   0x7   :  { %20 = vsyncpa [#allocation10 + $0x1], 0  ;;  %s781_s22 = smov 0   ;;  %s783_s23 = smov 0  }
   0x8   :  { %s785_s24 = smov 0   ;;  %s787_s25 = smov 0  }
   0x9 LB: > { %s802_s0 = sadd.s32 4294967295, %s730_s25   ;;  %s541_s26 = sadd.s32 4294967294, %s730_s25   ;;  %s730_s25 = sphi %s787_s25, %s960_s25   ;;  %s726_s24 = sphi %s785_s24, %s959_s24   ;;  %s722_s23 = sphi %s783_s23, %s958_s23   ;;  %s718_s22 = sphi %s781_s22, %s957_s22  }
   0xa   : > { %s806_s27 = sadd.s32 1, %s730_s25   ;;  %s122_s28 = sadd.s32 1, %s726_s24 }
   0xb   : > { %s119_s29 = ssub.s32 %s730_s25, %s806_s27  ;;  %p132_p0 = scmp.ne.s32.totalorder %s726_s24, %s722_s23 }
   0xc   : > { %p120_p1 = scmp.eq.s32.totalorder %s119_s29, 0  ;;  %p133_p2 = scmp.eq.s32.totalorder %s802_s0, 1 }
   0xd   : > { %p138_p3 = scmp.ne.s32.totalorder %s722_s23, %s718_s22  ;;  %p139_p4 = scmp.eq.s32.totalorder %s541_s26, 1 }
   0xe   : > { %s817_s30 = scalar_select %p120_p1, %s726_s24, %s122_s28  }
   0xf   : > { %p819_p5 = por %p133_p2, %p132_p0  ;;  %p823_p6 = por %p139_p4, %p138_p3 }
  0x10   : > { %p544_p7 = scmp.ge.s32.totalorder %s730_s25, 1  ;;  %p173_p8 = scmp.lt.s32.totalorder %s730_s25, 3 }
  0x12   : > { %p174_p9 = pnand %p544_p7, %p173_p8 }
  0x13   : > { %s195_s8 = sand.u32 (!%p174_p9), 1, %s722_s23   ;;  %p197_p10 = scmp.lt.s32.totalorder (!%p174_p9), %s802_s0, 1 }
  0x14   : > { %177 = sbr.rel (%p174_p9) target bundleno = 1044 (0x414), region = 36  ;;  %s201_s9 = sld [smem:[#allocation8 + %s802_s0]] (!%p174_p9) }
  0x15   : > { %s746_s18 = smov (!%p174_p9), 0   ;;  %s854_s26 = scalar_lea.vmem (!%p174_p9), [#allocation9], %s195_s8 }
  0x16   : > { %207 = sst [smem:[#allocation6]] (!%p174_p9), %s746_s18  ;;  %s732_s28 = smov (!%p174_p9), 0  }
  0x19   : > { %vm204_vm0 = vcmask 7168   ;;  %v745_v0 = vmov -1e+30   ;;  %v836_v1 = vld [vmem:[%s951_s2] sm:$0x1]  ;;  %s198_s12 = scalar_select %p197_p10, %s802_s0, 1 }
  0x1a   : > { %205 = vst.msk [vmem:[#allocation3] sm:$0xff] %vm204_vm0, %v745_v0  ;;  %v842_v2 = vld [vmem:[%s952_s3] sm:$0x1] }
  0x1b   : > { %v847_v3 = vld [vmem:[%s953_s4] sm:$0x1]  ;;  %s545_s17 = sshll.u32 %s198_s12, 3 }
  0x1c   : > { %s200_s21 = scalar_lea.vmem %s950_s1, %s545_s17 }
  0x1d   : > { %v202_v4 = vld [vmem:[%s200_s21] sm:$0xff] }
  0x1e   : > { %203 = vst [vmem:[#allocation2] sm:$0xff] %v202_v4 }
  0x1f LB: >> { %s217_s29 = sadd.s32 1, %s734_s28   ;;  %s546_s10 = sadd.s32 4294967295, %s734_s28  ;;  %s734_s28 = sphi %s732_s28, %s733_s28  }
  0x20   : >> { %p218_p11 = scmp.ge.s32.totalorder %s217_s29, %s201_s9  ;;  %s223_s12 = scalar_lea.smem [#allocation5], %s734_s28 }
  0x21   : >> { %224 = sst [smem:[%s223_s12]] %s546_s10  ;;  %s220_s13 = scalar_lea.smem [#allocation4], %s734_s28 }
  0x22   : >> { %s219_s11 = scalar_select %p218_p11, 8, %s217_s29 }
  0x23   : >> { %p213_p12 = scmp.ge.s32.totalorder %s217_s29, 8   ;;  %s733_s28 = smov %s217_s29  }
  0x24   : >> { %221 = sst [smem:[%s220_s13]] %s219_s11  ;;  %s856_s14 = sadd.s32 (%p213_p12), 4294967295, %s201_s9 }
  0x25   : > { %215 = sbr.rel (!%p213_p12) target bundleno = 31 (0x1f), region = 120  ;;  %p548_p13 = scmp.le.s32.totalorder (%p213_p12), %s856_s14, 0 }
  0x2a   : > { %512 = sbr.rel (%p548_p13) target bundleno = 199 (0xc7), region = 125  ;;  %s861_s15 = smov (!%p548_p13), 0  }
  0x2f LB: >> { %s232_s16 = scalar_lea.vmem [#allocation2], %s738_s15  ;;  %vm238_vm1 = vcmask 1040384   ;;  %vm275_vm8 = vcmask 0   ;;  %s274_s9 = scalar_lea.vmem [#allocation3], %s738_s15  ;;  %s738_s15 = sphi %s861_s15, %s229_s15  }
  0x30   : >> { %v233_v5 = vld [vmem:[%s232_s16] sm:$0x1]  ;;  %v549_v6 = vld [vmem:[%s232_s16 + $0x1] sm:$0x1]  ;;  %s229_s15 = sadd.s32 1, %s738_s15  }
  0x31   : >> { %v242_v7 = vmul.f32 %v233_v5, %v233_v5  ;;  %v237_v8 = vmul.f32 %v549_v6, %v233_v5  ;;  %v246_v11 = vmul.f32 %v549_v6, %v549_v6  ;;  %p228_p0 = scmp.ge.s32.totalorder %s229_s15, %s856_s14 }
  0x33   : >> { %v243_v9 = vsel %vm238_vm1, %v242_v7, 0.0  ;;  %v239_v10 = vsel %vm238_vm1, %v237_v8, 0.0  ;;  %v247_v12 = vsel %vm238_vm1, %v246_v11, 0.0 }
  0x34   : >> { %244 = vadd.xlane.f32.xlu0 %v243_v9  ;;  %240 = vadd.xlane.f32.xlu1 %v239_v10 }
  0x3c   : >> { %248 = vadd.xlane.f32.xlu0 %v247_v12 }
  0xa7   : >> { %v245_v13 = vpop.xlane.xlu0 %244  ;;  %v241_v29 = vpop.xlane.xlu1 %240 }
  0xa8   : >> { %v250_v14 = vadd.f32 1e-16, %v245_v13 }
  0xaa   : >> { %630 = vrsqrt.f32 %v250_v14  ;;  %vm257_vm3 = vweird.f32 %v250_v14 }
  0xaf   : >> { %v249_v15 = vpop.xlane.xlu0 %248 }
  0xb0   : >> { %v631_v16 = vpop.eup %630  ;;  %v262_v17 = vadd.f32 1e-16, %v249_v15 }
  0xb1   : >> { %v252_v18 = vmul.f32 %v631_v16, %v250_v14  ;;  %vm258_vm2 = vweird.f32 %v631_v16 }
  0xb2   : >> { %632 = vrsqrt.f32 %v262_v17  ;;  %vm259_vm4 = vmor %vm257_vm3, %vm258_vm2  ;;  %vm269_vm6 = vweird.f32 %v262_v17 }
  0xb3   : >> { %v253_v19 = vmul.f32 %v631_v16, %v252_v18 }
  0xb5   : >> { %v254_v20 = vmul.f32 0.5, %v253_v19 }
  0xb7   : >> { %v255_v21 = vsub.f32 1.5, %v254_v20 }
  0xb8   : >> { %v633_v22 = vpop.eup %632 }
  0xb9   : >> { %v264_v23 = vmul.f32 %v633_v22, %v262_v17  ;;  %v256_v25 = vmul.f32 %v631_v16, %v255_v21  ;;  %vm270_vm5 = vweird.f32 %v633_v22 }
  0xba   : >> { %vm271_vm7 = vmor %vm269_vm6, %vm270_vm5 }
  0xbb   : >> { %v265_v24 = vmul.f32 %v633_v22, %v264_v23  ;;  %v260_v28 = vsel %vm259_vm4, %v631_v16, %v256_v25 }
  0xbc   : >> { %v261_v31 = vmul.f32 %v260_v28, %v241_v29 }
  0xbd   : >> { %v266_v26 = vmul.f32 0.5, %v265_v24 }
  0xbf   : >> { %v267_v27 = vsub.f32 1.5, %v266_v26 }
  0xc1   : >> { %v268_v30 = vmul.f32 %v633_v22, %v267_v27 }
  0xc2   : > { %231 = sbr.rel (!%p228_p0) target bundleno = 47 (0x2f), region = 131 }
  0xc3   : >> { %v272_v32 = vsel %vm271_vm7, %v633_v22, %v268_v30 }
  0xc4   : >> { %v273_v33 = vmul.f32 %v272_v32, %v261_v31 }
  0xc6   : >> { %276 = vst.msk [vmem:[%s274_s9] sm:$0x1] %vm275_vm8, %v273_v33 }
  0xc7 PF: > { %517 = sbr.rel (%p548_p13) target bundleno = 1030 (0x406), region = 136  ;;  %s874_s17 = smov (!%p548_p13), 0  }
  0xcc LB: >> { %v294_v43 = vlaneseq  ;;  %vm339_vm14 = vcmask 0   ;;  %v747_v4 = vmov -1e+30   ;;  %s742_s17 = sphi %s874_s17, %s280_s17  }
  0xcd   : >> { %v283_v34 = vld [vmem:[#allocation3] sm:$0xff] }
  0xce   : >> { %v284_v35 = vsel %vm204_vm0, %v283_v34, -inf  ;;  %v295_v44 = vshrl.u32 %v294_v43, 7 }
  0xcf   : >> { %285 = vmax.xlane.f32.xlu0 %v284_v35 }
 0x142   : >> { %v286_v36 = vpop.xlane.xlu0 %285 }
 0x143   : >> { %v287_v37 = vrot.slane %v286_v36, 4 }
 0x145   : >> { %v288_v38 = vmax.f32 %v286_v36, %v287_v37 }
 0x147   : >> { %v289_v39 = vrot.slane %v288_v38, 2 }
 0x149   : >> { %v290_v40 = vmax.f32 %v288_v38, %v289_v39 }
 0x14b   : >> { %v291_v41 = vrot.slane %v290_v40, 1 }
 0x14d   : >> { %v292_v42 = vmax.f32 %v290_v40, %v291_v41 }
 0x14f   : >> { %556 = vpush %v292_v42 }
 0x180   : >> { %s557_s18 = spop %556 }
 0x181   : >> { %v296_v45 = vstv %s557_s18 }
 0x182   : >> { %vm297_vm9 = vcmp.ge.f32.partialorder %v283_v34, %v296_v45 }
 0x183   : >> { %v298_v46 = vsel %vm297_vm9, %v295_v44, 8 }
 0x184   : >> { %v299_v47 = vsel %vm204_vm0, %v298_v46, 2147483647 }
 0x185   : >> { %v301_v48 = vshra.s32 %v299_v47, 16  ;;  %v300_v50 = vand.u32 65535, %v299_v47 }
 0x187   : >> { %v303_v49 = vcvt.s32.f32 %v301_v48  ;;  %v302_v52 = vcvt.s32.f32 %v300_v50 }
 0x189   : >> { %304 = vmin.xlane.f32.xlu0 %v303_v49 }
 0x1fc   : >> { %v305_v51 = vpop.xlane.xlu0 %304 }
 0x1fd   : >> { %vm306_vm10 = vcmp.eq.f32.partialorder %v303_v49, %v305_v51  ;;  %v311_v54 = vcvt.f32.s32 %v305_v51 }
 0x1fe   : >> { %v307_v53 = vsel %vm306_vm10, %v302_v52, inf }
 0x1ff   : >> { %308 = vmin.xlane.f32.xlu1 %v307_v53  ;;  %v312_v56 = vshll.u32 %v311_v54, 16 }
 0x272   : >> { %v309_v55 = vpop.xlane.xlu1 %308 }
 0x273   : >> { %v310_v57 = vcvt.f32.s32 %v309_v55 }
 0x275   : >> { %v313_v58 = vadd.s32 %v312_v56, %v310_v57 }
 0x277   : >> { %v314_v59 = vrot.slane %v313_v58, 4 }
 0x279   : >> { %vm315_vm11 = vcmp.lt.s32.totalorder %v313_v58, %v314_v59 }
 0x27a   : >> { %v316_v60 = vsel %vm315_vm11, %v313_v58, %v314_v59 }
 0x27b   : >> { %v317_v61 = vrot.slane %v316_v60, 2 }
 0x27d   : >> { %vm318_vm12 = vcmp.lt.s32.totalorder %v316_v60, %v317_v61 }
 0x27e   : >> { %v319_v62 = vsel %vm318_vm12, %v316_v60, %v317_v61 }
 0x27f   : >> { %v320_v63 = vrot.slane %v319_v62, 1 }
 0x281   : >> { %vm321_vm13 = vcmp.lt.s32.totalorder %v319_v62, %v320_v63 }
 0x282   : >> { %v322_v0 = vsel %vm321_vm13, %v319_v62, %v320_v63 }
 0x283   : >> { %558 = vpush %v322_v0 }
 0x2b4   : >> { %s559_s19 = spop %558 }
 0x2b5   : >> { %s881_s20 = sld [smem:[#allocation4 + %s559_s19]]  ;;  %s338_s28 = scalar_lea.vmem [#allocation3], %s559_s19 }
 0x2b6   : >> { %s883_s21 = sld [smem:[#allocation5 + %s559_s19]]  ;;  %340 = vst.msk [vmem:[%s338_s28] sm:$0x1] %vm339_vm14, %v747_v4  ;;  %s325_s29 = scalar_lea.vmem [#allocation2], %s559_s19 }
 0x2b7   : >> { %v326_v5 = vld [vmem:[%s325_s29] sm:$0x1] }
 0x2b8   : >> { %v329_v7 = vmul.f32 %v326_v5, %v836_v1 }
 0x2bb   : >> { %s887_s10 = sld [smem:[#allocation4 + %s881_s20]]  ;;  %s327_s11 = scalar_lea.vmem [#allocation2], %s881_s20 }
 0x2bc   : >> { %v328_v6 = vld [vmem:[%s327_s11] sm:$0x1]  ;;  %s336_s12 = scalar_lea.smem [#allocation5], %s881_s20  ;;  %p551_p1 = scmp.lt.s32.totalorder %s883_s21, 0 }
 0x2bd   : >> { %v330_v8 = vmul.f32 %v328_v6, %v842_v2  ;;  %337 = sst [smem:[%s336_s12]] %s883_s21  ;;  %s347_s13 = scalar_lea.vmem (!%p551_p1), [#allocation2], %s883_s21 }
 0x2be   : >> { %s345_s15 = scalar_lea.smem (!%p551_p1), [#allocation4], %s883_s21  ;;  %s386_s16 = scalar_lea.vmem (!%p551_p1), [#allocation3], %s883_s21 }
 0x2bf   : >> { %v331_v9 = vadd.f32 %v330_v8, %v329_v7  ;;  %344 = sbr.rel (%p551_p1) target bundleno = 865 (0x361), region = 61  ;;  %346 = sst [smem:[%s345_s15]] (!%p551_p1), %s881_s20 }
 0x2c1   : >> { %v332_v10 = vadd.f32 %v331_v9, %v847_v3 }
 0x2c3   : >> { %333 = vst [vmem:[%s327_s11] sm:$0x1] %v332_v10 }
 0x2c4   : >> { %vm350_vm15 = vcmask 1040384   ;;  %v358_v16 = vmul.f32 %v332_v10, %v332_v10 }
 0x2c6   : >> { %v359_v17 = vsel %vm350_vm15, %v358_v16, 0.0 }
 0x2ca   : >> { %v348_v11 = vld [vmem:[%s347_s13] sm:$0x1] }
 0x2cb   : >> { %v354_v12 = vmul.f32 %v348_v11, %v348_v11  ;;  %v349_v13 = vmul.f32 %v348_v11, %v332_v10 }
 0x2cd   : >> { %v355_v14 = vsel %vm350_vm15, %v354_v12, 0.0  ;;  %v351_v15 = vsel %vm350_vm15, %v349_v13, 0.0 }
 0x2ce   : >> { %356 = vadd.xlane.f32.xlu0 %v355_v14  ;;  %352 = vadd.xlane.f32.xlu1 %v351_v15 }
 0x2d6   : >> { %360 = vadd.xlane.f32.xlu0 %v359_v17 }
 0x341   : >> { %v357_v18 = vpop.xlane.xlu0 %356  ;;  %v353_v34 = vpop.xlane.xlu1 %352 }
 0x342   : >> { %v362_v19 = vadd.f32 1e-16, %v357_v18 }
 0x344   : >> { %634 = vrsqrt.f32 %v362_v19  ;;  %vm369_vm2 = vweird.f32 %v362_v19 }
 0x349   : >> { %v361_v20 = vpop.xlane.xlu0 %360 }
 0x34a   : >> { %v635_v21 = vpop.eup %634  ;;  %v374_v22 = vadd.f32 1e-16, %v361_v20 }
 0x34b   : >> { %v364_v23 = vmul.f32 %v635_v21, %v362_v19  ;;  %vm370_vm1 = vweird.f32 %v635_v21 }
 0x34c   : >> { %636 = vrsqrt.f32 %v374_v22  ;;  %vm371_vm3 = vmor %vm369_vm2, %vm370_vm1  ;;  %vm381_vm5 = vweird.f32 %v374_v22 }
 0x34d   : >> { %v365_v24 = vmul.f32 %v635_v21, %v364_v23 }
 0x34f   : >> { %v366_v25 = vmul.f32 0.5, %v365_v24 }
 0x351   : >> { %v367_v26 = vsub.f32 1.5, %v366_v25 }
 0x352   : >> { %v637_v27 = vpop.eup %636 }
 0x353   : >> { %v376_v28 = vmul.f32 %v637_v27, %v374_v22  ;;  %v368_v30 = vmul.f32 %v635_v21, %v367_v26  ;;  %vm382_vm4 = vweird.f32 %v637_v27 }
 0x354   : >> { %vm383_vm6 = vmor %vm381_vm5, %vm382_vm4 }
 0x355   : >> { %v377_v29 = vmul.f32 %v637_v27, %v376_v28  ;;  %v372_v33 = vsel %vm371_vm3, %v635_v21, %v368_v30 }
 0x356   : >> { %v373_v36 = vmul.f32 %v372_v33, %v353_v34 }
 0x357   : >> { %v378_v31 = vmul.f32 0.5, %v377_v29 }
 0x359   : >> { %v379_v32 = vsub.f32 1.5, %v378_v31 }
 0x35b   : >> { %v380_v35 = vmul.f32 %v637_v27, %v379_v32 }
 0x35d   : >> { %v384_v37 = vsel %vm383_vm6, %v637_v27, %v380_v35 }
 0x35e   : >> { %v385_v38 = vmul.f32 %v384_v37, %v373_v36 }
 0x360   : >> { %387 = vst.msk [vmem:[%s386_s16] sm:$0x1] %vm339_vm14, %v385_v38 }
 0x361 PF: >> { %561 = sst [smem:[#allocation6]] (%p551_p1), %s881_s20  ;;  %p553_p2 = scmp.ge.s32.totalorder %s887_s10, 8 }
 0x362   : >> { %s397_s9 = scalar_lea.vmem (!%p553_p2), [#allocation2], %s887_s10  ;;  %s436_s18 = scalar_lea.vmem (!%p553_p2), [#allocation3], %s881_s20 }
 0x363   : >> { %396 = sbr.rel (%p553_p2) target bundleno = 1022 (0x3fe), region = 69 }
 0x368   : >> { %vm400_vm7 = vcmask 1040384   ;;  %v404_v39 = vmul.f32 %v332_v10, %v332_v10  ;;  %v398_v40 = vld [vmem:[%s397_s9] sm:$0x1] }
 0x369   : >> { %v399_v42 = vmul.f32 %v398_v40, %v332_v10  ;;  %v408_v43 = vmul.f32 %v398_v40, %v398_v40 }
 0x36a   : >> { %v405_v41 = vsel %vm400_vm7, %v404_v39, 0.0 }
 0x36b   : >> { %406 = vadd.xlane.f32.xlu0 %v405_v41  ;;  %v401_v44 = vsel %vm400_vm7, %v399_v42, 0.0  ;;  %v409_v45 = vsel %vm400_vm7, %v408_v43, 0.0 }
 0x36c   : >> { %402 = vadd.xlane.f32.xlu1 %v401_v44 }
 0x373   : >> { %410 = vadd.xlane.f32.xlu0 %v409_v45 }
 0x3de   : >> { %v407_v46 = vpop.xlane.xlu0 %406 }
 0x3df   : >> { %v412_v47 = vadd.f32 1e-16, %v407_v46  ;;  %v403_v62 = vpop.xlane.xlu1 %402 }
 0x3e1   : >> { %638 = vrsqrt.f32 %v412_v47  ;;  %vm419_vm9 = vweird.f32 %v412_v47 }
 0x3e6   : >> { %v411_v48 = vpop.xlane.xlu0 %410 }
 0x3e7   : >> { %v639_v49 = vpop.eup %638  ;;  %v424_v50 = vadd.f32 1e-16, %v411_v48 }
 0x3e8   : >> { %v414_v51 = vmul.f32 %v639_v49, %v412_v47  ;;  %vm420_vm8 = vweird.f32 %v639_v49 }
 0x3e9   : >> { %640 = vrsqrt.f32 %v424_v50  ;;  %vm421_vm10 = vmor %vm419_vm9, %vm420_vm8  ;;  %vm431_vm12 = vweird.f32 %v424_v50 }
 0x3ea   : >> { %v415_v52 = vmul.f32 %v639_v49, %v414_v51 }
 0x3ec   : >> { %v416_v53 = vmul.f32 0.5, %v415_v52 }
 0x3ee   : >> { %v417_v54 = vsub.f32 1.5, %v416_v53 }
 0x3ef   : >> { %v641_v55 = vpop.eup %640 }
 0x3f0   : >> { %v426_v56 = vmul.f32 %v641_v55, %v424_v50  ;;  %v418_v58 = vmul.f32 %v639_v49, %v417_v54  ;;  %vm432_vm11 = vweird.f32 %v641_v55 }
 0x3f1   : >> { %vm433_vm13 = vmor %vm431_vm12, %vm432_vm11 }
 0x3f2   : >> { %v427_v57 = vmul.f32 %v641_v55, %v426_v56  ;;  %v422_v61 = vsel %vm421_vm10, %v639_v49, %v418_v58 }
 0x3f3   : >> { %v423_v0 = vmul.f32 %v422_v61, %v403_v62 }
 0x3f4   : >> { %v428_v59 = vmul.f32 0.5, %v427_v57 }
 0x3f6   : >> { %v429_v60 = vsub.f32 1.5, %v428_v59 }
 0x3f8   : >> { %v430_v63 = vmul.f32 %v641_v55, %v429_v60 }
 0x3fa   : >> { %v434_v4 = vsel %vm433_vm13, %v641_v55, %v430_v63 }
 0x3fb   : >> { %v435_v5 = vmul.f32 %v434_v4, %v423_v0 }
 0x3fd   : >> { %437 = vst.msk [vmem:[%s436_s18] sm:$0x1] %vm339_vm14, %v435_v5 }
 0x3fe PF: >> { %s280_s17 = sadd.s32 1, %s742_s17  }
 0x3ff   : >> { %p279_p3 = scmp.ge.s32.totalorder %s280_s17, %s856_s14 }
 0x401   : > { %282 = sbr.rel (!%p279_p3) target bundleno = 204 (0xcc), region = 142 }
 0x406 PF: > { %s438_s19 = sld [smem:[#allocation6]]  ;;  %s451_s20 = scalar_lea.hbm %s954_s5, %s802_s0 }
 0x407   : > { %s453_s29 = sshll.u32 %s854_s26, 4  ;;  %s455_s10 = sshll.u32 %s451_s20, 4  ;;  %s454_s29 = int_to_ptr.vmem [resolvable:$true] %s453_s29  ;;  %s456_s10 = int_to_ptr.hbm [resolvable:$true] %s455_s10 }
 0x408   : > { %s443_s17 = scalar_lea.sflag [#allocation10], %s195_s8  ;;  %s668_s14 = sshra.s32 %s456_s10, 4  ;;  %s669_s14 = int_to_ptr.hbm [resolvable:$true] %s668_s14 }
 0x409   : > { %s670_s12 = scalar_lea.hbm %s669_s14, 1  ;;  %s674_s0 = scalar_lea.hbm %s954_s5, 2 }
 0x40a   : > { %p671_p4 = scmp.ne.s32.totalorder %s669_s14, %s670_s12  ;;  %p675_p9 = scmp.lt.s32.totalorder %s669_s14, %s954_s5 }
 0x40b   : > { %p676_p10 = scmp.lt.s32.totalorder %s674_s0, %s670_s12 }
 0x40c   : > { %s439_s11 = scalar_lea.vmem [#allocation2], %s438_s19  ;;  %p672_p7 = pnand %p671_p4, %p819_p5 }
 0x40d   : > { %v440_v6 = vld [vmem:[%s439_s11] sm:$0x1]  ;;  %p677_p11 = por %p676_p10, %p675_p9 }
 0x40e   : > { %441 = vst [vmem:[%s854_s26] sm:$0x1] %v440_v6  ;;  %p673_p8 = pneg %p672_p7 }
 0x410   : > { %p678_p12 = pnand %p677_p11, %p673_p8 }
 0x412   : > { %681 = shalt.err (!%p678_p12)
}
 0x413   : > { %562 = dma.vmem_to_hbm [thread:$0]  (%p819_p5), %s454_s29, 16, %s456_s10, %s443_s17  }
 0x414 PF: > { %p569_p13 = scmp.ge.s32.totalorder %s730_s25, 2  ;;  %s467_s8 = sand.u32 1, %s718_s22  }
 0x415   : > { %s468_s26 = scalar_lea.sflag [#allocation10], %s467_s8 }
 0x416   : > { %p565_p0 = pnand %p569_p13, %p823_p6 }
 0x418   : > { %p566_p1 = pneg %p565_p0 }
 0x41a   : > { %713 = dma.done.wait (%p566_p1), %s468_s26, 16  }
 0x41b   : > { %715 = vsyncadd (%p566_p1), %s468_s26, 4294967280  ;;  %p23_p2 = scmp.ge.s32.totalorder %s806_s27, 4   ;;  %s957_s22 = smov %s722_s23 }
 0x41c   : > { %s958_s23 = smov %s726_s24  ;;  %s959_s24 = smov %s817_s30 }
 0x41d   : > { %s960_s25 = smov %s806_s27  ;;  %25 = sbr.rel (!%p23_p2) target bundleno = 9 (0x9), region = 153 }
 0x422   :  { %473 = vsyncpa [#allocation10], 1 }
 0x423   :  { %475 = vsyncpa [#allocation10 + $0x1], 1 }

</bundles_post_ra>
